<compile_context>
chip_gen: v5e
topology: v5e:2x2
jax: 0.10.0
libtpu: 0.0.40
codegen_flags: <defaults>
</compile_context>

<pallas_src>
import jax
import jax.numpy as jnp
from jax.experimental import pallas as pl
from jax.experimental.pallas import tpu as pltpu


def _round_up(x, m):
    return ((x + m - 1) // m) * m


def _largest_divisor_leq(n, k):
    k = max(1, min(n, k))
    while n % k:
        k -= 1
    return k


# ----------------------------------------------------------------------------
# Kernel factory: closes over the static per-tensor metadata.
# ----------------------------------------------------------------------------
def _make_kernel(n_tensors, tensor_meta, n_steps):
    """tensor_meta: list of (C_i, lane_width_i, n_spatial_steps_i)."""

    def kernel(*refs):
        x_refs = refs[:n_tensors]
        w1_ref, b1_ref, w2_ref, b2_ref, w3_ref, b3_ref = refs[n_tensors:n_tensors + 6]
        out_ref = refs[n_tensors + 6]
        acc_refs = refs[n_tensors + 7:]            # one lane-width acc per tensor

        s = pl.program_id(1)

        @pl.when(s == 0)
        def _init():
            for acc in acc_refs:
                acc[...] = jnp.zeros_like(acc)

        # Streaming phase: elementwise-add the 128-lane chunks of this spatial tile
        # into the lane-width accumulator (VPU only; no per-step XLU reduce).
        for x_ref, acc, (_c, width, n_i) in zip(x_refs, acc_refs, tensor_meta):
            def accumulate(x_ref=x_ref, acc=acc, width=width):
                x = x_ref[...].astype(jnp.float32)         # [b_tile, C_i, width]
                partial = x[..., 0:128]
                for k in range(1, width // 128):
                    partial = partial + x[..., k * 128:(k + 1) * 128]
                acc[...] += partial

            if n_i == n_steps:
                accumulate()
            else:
                # This tensor has fewer spatial tiles than the grid: its index map
                # clamps (no re-DMA) and this guard prevents double counting.
                pl.when(s < n_i)(accumulate)

        @pl.when(s == n_steps - 1)
        def _finalize():
            # Single cross-lane reduce per tensor, concat -> feature vector.
            feat = jnp.concatenate(
                [jnp.sum(acc[...], axis=-1) for acc in acc_refs], axis=-1)
            # Mean scale already folded into w1 rows.
            h = jnp.dot(feat, w1_ref[...], preferred_element_type=jnp.float32) + b1_ref[...]
            h = jnp.maximum(h, 0.0)
            h = jnp.dot(h, w2_ref[...], preferred_element_type=jnp.float32) + b2_ref[...]
            h = jnp.maximum(h, 0.0)
            o = jnp.dot(h, w3_ref[...], preferred_element_type=jnp.float32) + b3_ref[...]
            out_ref[...] = o.astype(out_ref.dtype)

    return kernel


# ----------------------------------------------------------------------------
# Wrapper: per-tensor minimal padding + bf16 cast, fold mean into w1, pallas_call.
# ----------------------------------------------------------------------------
def simple_gap_forward(x_nested, params, *, b_tile=8, s_tile=512,
                       x_dtype=jnp.bfloat16):
    """x_nested: list of lists of NCHW arrays [B, C_i, H_i, W_i]. Returns [B, proj_dim]."""
    tensors = [s for y in x_nested for s in y]          # same flattening as torch loop
    B = tensors[0].shape[0]
    w1, b1, w2, b2, w3, b3 = params
    proj_dim = w3.shape[1]

    chans = [int(t.shape[1]) for t in tensors]
    spatials = [int(t.shape[2]) * int(t.shape[3]) for t in tensors]
    assert w1.shape[0] == sum(chans)

    # Fold each tensor's adaptive-avg-pool 1/(H_i*W_i) into its rows of w1.
    scale_rows = jnp.concatenate(
        [jnp.full((c, 1), 1.0 / s, dtype=w1.dtype) for c, s in zip(chans, spatials)],
        axis=0)
    w1s = w1 * scale_rows                               # [C_total, hidden]

    # Common lane tile (multiple of 128), capped by the largest spatial extent.
    st = max(128, _round_up(min(int(s_tile), max(spatials)), 128))

    xs, meta = [], []
    for t, c, s in zip(tensors, chans, spatials):
        f = t.reshape(B, c, s)
        if x_dtype is not None and f.dtype != x_dtype:
            f = f.astype(x_dtype)                       # halves HBM read traffic
        if s <= st:                                     # whole tensor fits one tile
            width, n_i = _round_up(s, 128), 1
        else:                                           # pad only to own multiple of st
            width, n_i = st, _round_up(s, st) // st
        s_pad = width * n_i
        if s_pad != s:
            f = jnp.pad(f, ((0, 0), (0, 0), (0, s_pad - s)))
        xs.append(f)
        meta.append((c, width, n_i))
    n_steps = max(n for (_, _, n) in meta)

    bt = _largest_divisor_leq(B, b_tile)
    grid = (B // bt, n_steps)

    def x_spec(c, width, n_i):
        if n_i == n_steps:
            imap = lambda b, s: (b, 0, s)
        elif n_i == 1:
            imap = lambda b, s: (b, 0, 0)               # constant -> fetched once
        else:
            imap = lambda b, s, _n=n_i: (b, 0, jnp.minimum(s, _n - 1))  # clamp: no re-DMA
        return pl.BlockSpec((bt, c, width), imap)

    # Weights/biases: full-array blocks, constant index maps -> VMEM-resident.
    # TODO(synk): pipeline_mode=pl.Buffered(1) would single-buffer these on v7x.
    def const_spec(arr):
        return pl.BlockSpec(arr.shape, lambda b, s, _nd=arr.ndim: (0,) * _nd)

    # Rough VMEM footprint -> scoped limit (double-buffered x tiles + weights + accs).
    x_item = jnp.dtype(x_dtype if x_dtype is not None else tensors[0].dtype).itemsize
    est = (sum(2 * bt * c * w * x_item for (c, w, _) in meta)
           + sum(bt * c * 128 * 4 for (c, _, _) in meta)
           + 2 * sum(int(a.size) * a.dtype.itemsize for a in (w1s, b1, w2, b2, w3, b3))
           + 2 * bt * proj_dim * 4)
    vmem_limit = int(min(max(2 * est, 32 * 1024 * 1024), 64 * 1024 * 1024))

    kernel = _make_kernel(len(xs), meta, n_steps)

    out = pl.pallas_call(
        kernel,
        out_shape=jax.ShapeDtypeStruct((B, proj_dim), jnp.float32),
        grid_spec=pltpu.PrefetchScalarGridSpec(
            num_scalar_prefetch=0,
            grid=grid,
            in_specs=[x_spec(c, w, n) for (c, w, n) in meta]
                     + [const_spec(a) for a in (w1s, b1, w2, b2, w3, b3)],
            out_specs=pl.BlockSpec((bt, proj_dim), lambda b, s: (b, 0)),
            scratch_shapes=[pltpu.VMEM((bt, c, 128), jnp.float32) for (c, _, _) in meta],
        ),
        compiler_params=pltpu.CompilerParams(
            dimension_semantics=("parallel", "arbitrary"),
            vmem_limit_bytes=vmem_limit,
        ),
    )(*xs, w1s, b1, w2, b2, w3, b3)

    return out


# ----------------------------------------------------------------------------
# Deterministic parameter construction (shapes from __init__ / make_fc).
# ----------------------------------------------------------------------------
def init_params(key, in_features, hidden_dim, out_features):
    ks = jax.random.split(key, 6)

    def lin(kw, kb, fan_in, fan_out):
        scale = 1.0 / jnp.sqrt(fan_in)
        w = jax.random.uniform(kw, (fan_in, fan_out), jnp.float32, -scale, scale)
        b = jax.random.uniform(kb, (1, fan_out), jnp.float32, -scale, scale)
        return w, b

    w1, b1 = lin(ks[0], ks[1], in_features, hidden_dim)
    w2, b2 = lin(ks[2], ks[3], hidden_dim, hidden_dim)
    w3, b3 = lin(ks[4], ks[5], hidden_dim, out_features)
    return (w1, b1, w2, b2, w3, b3)


if __name__ == "__main__":
    # flags.encoder.one_hop_dims = [4, 8]; flags.cnn_dim = 32
    one_hop_dims = [4, 8]
    proj_dim = 32
    B = 2

    key = jax.random.PRNGKey(0)
    k1, k2, kp = jax.random.split(key, 3)

    # Nested input (list of lists of NCHW feature maps) with DIFFERENT spatial sizes,
    # exercising per-tensor padding, clamped index maps, and the multi-step reduction.
    s1 = jax.random.normal(k1, (B, one_hop_dims[0], 16, 16), jnp.float32)
    s2 = jax.random.normal(k2, (B, one_hop_dims[1], 8, 8), jnp.float32)
    x = [[s1], [s2]]

    params = init_params(kp, sum(one_hop_dims), proj_dim, proj_dim)

    # s_tile=128 -> tensor 1 takes 2 spatial steps, tensor 2 takes 1 (tests the guard).
    out = simple_gap_forward(x, params, b_tile=2, s_tile=128)
    out = jax.block_until_ready(out)

    # Pure-JAX reference of the module semantics, with the same bf16 input rounding
    # the kernel reads (accumulation itself is f32 in both).
    def gap_bf16(t):
        return t.astype(jnp.bfloat16).astype(jnp.float32).mean(axis=(2, 3))

    feat = jnp.concatenate([gap_bf16(s1), gap_bf16(s2)], axis=-1)
    w1, b1, w2, b2, w3, b3 = params
    ref = jnp.maximum(feat @ w1 + b1, 0.0)
    ref = jnp.maximum(ref @ w2 + b2, 0.0)
    ref = ref @ w3 + b3

    assert out.shape == (B, proj_dim)
    err = float(jnp.abs(out - ref).max())
    assert jnp.allclose(out, ref, atol=2e-3, rtol=2e-3), err

    print("KERNEL_OK")
</pallas_src>

<mosaic_0001>
module attributes {stable_mosaic.version = 11 : i64} {
  func.func @kernel(%arg0: i32, %arg1: i32, %arg2: memref<2x4x128xbf16, #tpu.memory_space<vmem>>, %arg3: memref<2x8x128xbf16, #tpu.memory_space<vmem>>, %arg4: memref<12x32xf32, #tpu.memory_space<vmem>>, %arg5: memref<1x32xf32, #tpu.memory_space<vmem>>, %arg6: memref<32x32xf32, #tpu.memory_space<vmem>>, %arg7: memref<1x32xf32, #tpu.memory_space<vmem>>, %arg8: memref<32x32xf32, #tpu.memory_space<vmem>>, %arg9: memref<1x32xf32, #tpu.memory_space<vmem>>, %arg10: memref<2x32xf32, #tpu.memory_space<vmem>>, %arg11: memref<2x4x128xf32, #tpu.memory_space<vmem>>, %arg12: memref<2x8x128xf32, #tpu.memory_space<vmem>>) attributes {dimension_semantics = [#tpu.dimension_semantics<parallel>, #tpu.dimension_semantics<arbitrary>], iteration_bounds = array<i64: 1, 2>, scalar_prefetch = 0 : i64, scratch_operands = 2 : i64, tpu.core_type = #tpu.core_type<tc>, window_params = [{transform_indices = @transform_0, window_bounds = array<i64: 2, 4, 128>}, {transform_indices = @transform_1, window_bounds = array<i64: 2, 8, 128>}, {pipeline_mode = #tpu.pipeline_mode<synchronous>, transform_indices = @transform_2, window_bounds = array<i64: 12, 32>}, {pipeline_mode = #tpu.pipeline_mode<synchronous>, transform_indices = @transform_3, window_bounds = array<i64: 1, 32>}, {pipeline_mode = #tpu.pipeline_mode<synchronous>, transform_indices = @transform_4, window_bounds = array<i64: 32, 32>}, {pipeline_mode = #tpu.pipeline_mode<synchronous>, transform_indices = @transform_5, window_bounds = array<i64: 1, 32>}, {pipeline_mode = #tpu.pipeline_mode<synchronous>, transform_indices = @transform_6, window_bounds = array<i64: 32, 32>}, {pipeline_mode = #tpu.pipeline_mode<synchronous>, transform_indices = @transform_7, window_bounds = array<i64: 1, 32>}, {transform_indices = @transform_8, window_bounds = array<i64: 2, 32>}]} {
    %c0_i32 = arith.constant 0 : i32
    %0 = arith.cmpi eq, %arg1, %c0_i32 : i32
    %1 = arith.extui %0 : i1 to i32
    %c0_i32_0 = arith.constant 0 : i32
    %2 = arith.cmpi ne, %1, %c0_i32_0 : i32
    scf.if %2 {
      %cst = arith.constant 0.000000e+00 : f32
      %14 = vector.broadcast %cst : f32 to vector<2x4x128xf32>
      %c0_12 = arith.constant 0 : index
      %c0_13 = arith.constant 0 : index
      %c0_14 = arith.constant 0 : index
      %15 = vector.load %arg11[%c0_12, %c0_13, %c0_14] : memref<2x4x128xf32, #tpu.memory_space<vmem>>, vector<2x4x128xf32>
      tpu.vector_store %arg11[%c0_12, %c0_13, %c0_14], %14 {strides = array<i32>} : memref<2x4x128xf32, #tpu.memory_space<vmem>>, vector<2x4x128xf32>,
      %cst_15 = arith.constant 0.000000e+00 : f32
      %16 = vector.broadcast %cst_15 : f32 to vector<2x8x128xf32>
      %c0_16 = arith.constant 0 : index
      %c0_17 = arith.constant 0 : index
      %c0_18 = arith.constant 0 : index
      %17 = vector.load %arg12[%c0_16, %c0_17, %c0_18] : memref<2x8x128xf32, #tpu.memory_space<vmem>>, vector<2x8x128xf32>
      tpu.vector_store %arg12[%c0_16, %c0_17, %c0_18], %16 {strides = array<i32>} : memref<2x8x128xf32, #tpu.memory_space<vmem>>, vector<2x8x128xf32>,
    } else {
    }
    %c0 = arith.constant 0 : index
    %c0_1 = arith.constant 0 : index
    %c0_2 = arith.constant 0 : index
    %3 = vector.load %arg2[%c0, %c0_1, %c0_2] : memref<2x4x128xbf16, #tpu.memory_space<vmem>>, vector<2x4x128xbf16>
    %4 = arith.extf %3 : vector<2x4x128xbf16> to vector<2x4x128xf32>
    %c0_3 = arith.constant 0 : index
    %c0_4 = arith.constant 0 : index
    %c0_5 = arith.constant 0 : index
    %5 = vector.load %arg11[%c0_3, %c0_4, %c0_5] : memref<2x4x128xf32, #tpu.memory_space<vmem>>, vector<2x4x128xf32>
    %6 = arith.addf %5, %4 : vector<2x4x128xf32>
    %c0_6 = arith.constant 0 : index
    %c0_7 = arith.constant 0 : index
    %c0_8 = arith.constant 0 : index
    %7 = vector.load %arg11[%c0_6, %c0_7, %c0_8] : memref<2x4x128xf32, #tpu.memory_space<vmem>>, vector<2x4x128xf32>
    tpu.vector_store %arg11[%c0_6, %c0_7, %c0_8], %6 {strides = array<i32>} : memref<2x4x128xf32, #tpu.memory_space<vmem>>, vector<2x4x128xf32>,
    %c1_i32 = arith.constant 1 : i32
    %8 = arith.cmpi slt, %arg1, %c1_i32 : i32
    %9 = arith.extui %8 : i1 to i32
    %c0_i32_9 = arith.constant 0 : i32
    %10 = arith.cmpi ne, %9, %c0_i32_9 : i32
    scf.if %10 {
      %c0_12 = arith.constant 0 : index
      %c0_13 = arith.constant 0 : index
      %c0_14 = arith.constant 0 : index
      %14 = vector.load %arg3[%c0_12, %c0_13, %c0_14] : memref<2x8x128xbf16, #tpu.memory_space<vmem>>, vector<2x8x128xbf16>
      %15 = arith.extf %14 : vector<2x8x128xbf16> to vector<2x8x128xf32>
      %c0_15 = arith.constant 0 : index
      %c0_16 = arith.constant 0 : index
      %c0_17 = arith.constant 0 : index
      %16 = vector.load %arg12[%c0_15, %c0_16, %c0_17] : memref<2x8x128xf32, #tpu.memory_space<vmem>>, vector<2x8x128xf32>
      %17 = arith.addf %16, %15 : vector<2x8x128xf32>
      %c0_18 = arith.constant 0 : index
      %c0_19 = arith.constant 0 : index
      %c0_20 = arith.constant 0 : index
      %18 = vector.load %arg12[%c0_18, %c0_19, %c0_20] : memref<2x8x128xf32, #tpu.memory_space<vmem>>, vector<2x8x128xf32>
      tpu.vector_store %arg12[%c0_18, %c0_19, %c0_20], %17 {strides = array<i32>} : memref<2x8x128xf32, #tpu.memory_space<vmem>>, vector<2x8x128xf32>,
    } else {
    }
    %c1_i32_10 = arith.constant 1 : i32
    %11 = arith.cmpi eq, %arg1, %c1_i32_10 : i32
    %12 = arith.extui %11 : i1 to i32
    %c0_i32_11 = arith.constant 0 : i32
    %13 = arith.cmpi ne, %12, %c0_i32_11 : i32
    scf.if %13 {
      %c0_12 = arith.constant 0 : index
      %c0_13 = arith.constant 0 : index
      %c0_14 = arith.constant 0 : index
      %14 = vector.load %arg11[%c0_12, %c0_13, %c0_14] : memref<2x4x128xf32, #tpu.memory_space<vmem>>, vector<2x4x128xf32>
      %cst = arith.constant dense<0.000000e+00> : vector<2x4xf32>
      %15 = vector.multi_reduction <add>, %14, %cst [2] : vector<2x4x128xf32> to vector<2x4xf32>
      %c0_15 = arith.constant 0 : index
      %c0_16 = arith.constant 0 : index
      %c0_17 = arith.constant 0 : index
      %16 = vector.load %arg12[%c0_15, %c0_16, %c0_17] : memref<2x8x128xf32, #tpu.memory_space<vmem>>, vector<2x8x128xf32>
      %cst_18 = arith.constant dense<0.000000e+00> : vector<2x8xf32>
      %17 = vector.multi_reduction <add>, %16, %cst_18 [2] : vector<2x8x128xf32> to vector<2x8xf32>
      %18 = tpu.concatenate %15, %17 in 1 : vector<2x4xf32>, vector<2x8xf32> -> vector<2x12xf32>
      %c0_19 = arith.constant 0 : index
      %c0_20 = arith.constant 0 : index
      %19 = vector.load %arg4[%c0_19, %c0_20] : memref<12x32xf32, #tpu.memory_space<vmem>>, vector<12x32xf32>
      %cst_21 = arith.constant dense<0.000000e+00> : vector<2x32xf32>
      %20 = tpu.matmul %18, %19, %cst_21 {dimension_numbers = #tpu.dot_dimension_numbers<[1], [0], [0], [1], [0, 0, 1, 1], [], []>} : vector<2x12xf32>, vector<12x32xf32>, vector<2x32xf32> -> vector<2x32xf32>
      %c0_22 = arith.constant 0 : index
      %c0_23 = arith.constant 0 : index
      %21 = vector.load %arg5[%c0_22, %c0_23] : memref<1x32xf32, #tpu.memory_space<vmem>>, vector<1x32xf32>
      %22 = vector.broadcast %21 : vector<1x32xf32> to vector<2x32xf32>
      %23 = arith.addf %20, %22 : vector<2x32xf32>
      %cst_24 = arith.constant 0.000000e+00 : f32
      %24 = vector.broadcast %cst_24 : f32 to vector<2x32xf32>
      %25 = arith.maximumf %23, %24 : vector<2x32xf32>
      %c0_25 = arith.constant 0 : index
      %c0_26 = arith.constant 0 : index
      %26 = vector.load %arg6[%c0_25, %c0_26] : memref<32x32xf32, #tpu.memory_space<vmem>>, vector<32x32xf32>
      %cst_27 = arith.constant dense<0.000000e+00> : vector<2x32xf32>
      %27 = tpu.matmul %25, %26, %cst_27 {dimension_numbers = #tpu.dot_dimension_numbers<[1], [0], [0], [1], [0, 0, 1, 1], [], []>} : vector<2x32xf32>, vector<32x32xf32>, vector<2x32xf32> -> vector<2x32xf32>
      %c0_28 = arith.constant 0 : index
      %c0_29 = arith.constant 0 : index
      %28 = vector.load %arg7[%c0_28, %c0_29] : memref<1x32xf32, #tpu.memory_space<vmem>>, vector<1x32xf32>
      %29 = vector.broadcast %28 : vector<1x32xf32> to vector<2x32xf32>
      %30 = arith.addf %27, %29 : vector<2x32xf32>
      %cst_30 = arith.constant 0.000000e+00 : f32
      %31 = vector.broadcast %cst_30 : f32 to vector<2x32xf32>
      %32 = arith.maximumf %30, %31 : vector<2x32xf32>
      %c0_31 = arith.constant 0 : index
      %c0_32 = arith.constant 0 : index
      %33 = vector.load %arg8[%c0_31, %c0_32] : memref<32x32xf32, #tpu.memory_space<vmem>>, vector<32x32xf32>
      %cst_33 = arith.constant dense<0.000000e+00> : vector<2x32xf32>
      %34 = tpu.matmul %32, %33, %cst_33 {dimension_numbers = #tpu.dot_dimension_numbers<[1], [0], [0], [1], [0, 0, 1, 1], [], []>} : vector<2x32xf32>, vector<32x32xf32>, vector<2x32xf32> -> vector<2x32xf32>
      %c0_34 = arith.constant 0 : index
      %c0_35 = arith.constant 0 : index
      %35 = vector.load %arg9[%c0_34, %c0_35] : memref<1x32xf32, #tpu.memory_space<vmem>>, vector<1x32xf32>
      %36 = vector.broadcast %35 : vector<1x32xf32> to vector<2x32xf32>
      %37 = arith.addf %34, %36 : vector<2x32xf32>
      %c0_36 = arith.constant 0 : index
      %c0_37 = arith.constant 0 : index
      %38 = vector.load %arg10[%c0_36, %c0_37] : memref<2x32xf32, #tpu.memory_space<vmem>>, vector<2x32xf32>
      tpu.vector_store %arg10[%c0_36, %c0_37], %37 {strides = array<i32>} : memref<2x32xf32, #tpu.memory_space<vmem>>, vector<2x32xf32>,
    } else {
    }
    return
  }
  func.func @transform_0(%arg0: i32, %arg1: i32) -> (i32, i32, i32) {
    %c0_i32 = arith.constant 0 : i32
    %c0_i32_0 = arith.constant 0 : i32
    return %arg0, %c0_i32, %arg1 : i32, i32, i32
  }
  func.func @transform_1(%arg0: i32, %arg1: i32) -> (i32, i32, i32) {
    %c0_i32 = arith.constant 0 : i32
    %c0_i32_0 = arith.constant 0 : i32
    %c0_i32_1 = arith.constant 0 : i32
    return %arg0, %c0_i32, %c0_i32_0 : i32, i32, i32
  }
  func.func @transform_2(%arg0: i32, %arg1: i32) -> (i32, i32) {
    %c0_i32 = arith.constant 0 : i32
    %c0_i32_0 = arith.constant 0 : i32
    %c0_i32_1 = arith.constant 0 : i32
    return %c0_i32, %c0_i32_0 : i32, i32
  }
  func.func @transform_3(%arg0: i32, %arg1: i32) -> (i32, i32) {
    %c0_i32 = arith.constant 0 : i32
    %c0_i32_0 = arith.constant 0 : i32
    %c0_i32_1 = arith.constant 0 : i32
    return %c0_i32, %c0_i32_0 : i32, i32
  }
  func.func @transform_4(%arg0: i32, %arg1: i32) -> (i32, i32) {
    %c0_i32 = arith.constant 0 : i32
    %c0_i32_0 = arith.constant 0 : i32
    %c0_i32_1 = arith.constant 0 : i32
    return %c0_i32, %c0_i32_0 : i32, i32
  }
  func.func @transform_5(%arg0: i32, %arg1: i32) -> (i32, i32) {
    %c0_i32 = arith.constant 0 : i32
    %c0_i32_0 = arith.constant 0 : i32
    %c0_i32_1 = arith.constant 0 : i32
    return %c0_i32, %c0_i32_0 : i32, i32
  }
  func.func @transform_6(%arg0: i32, %arg1: i32) -> (i32, i32) {
    %c0_i32 = arith.constant 0 : i32
    %c0_i32_0 = arith.constant 0 : i32
    %c0_i32_1 = arith.constant 0 : i32
    return %c0_i32, %c0_i32_0 : i32, i32
  }
  func.func @transform_7(%arg0: i32, %arg1: i32) -> (i32, i32) {
    %c0_i32 = arith.constant 0 : i32
    %c0_i32_0 = arith.constant 0 : i32
    %c0_i32_1 = arith.constant 0 : i32
    return %c0_i32, %c0_i32_0 : i32, i32
  }
  func.func @transform_8(%arg0: i32, %arg1: i32) -> (i32, i32) {
    %c0_i32 = arith.constant 0 : i32
    %c0_i32_0 = arith.constant 0 : i32
    return %arg0, %c0_i32 : i32, i32
  }
}

</mosaic_0001>

<bundles_post_ra>
// kernel: tpu_custom_call.1
= control target key start
LH: loop header
LB: loop body
LE: loop exit
PB: predicated region body
PF: predicated region fallthrough
CT: control target
= control target key end

     0   :  { %s1291_s0 = inlined_call_operand.hbm [shape: bf16[2,4,256], index: 0, kind: input, shape index: {}]   ;;  %s1292_s1 = inlined_call_operand.hbm [shape: bf16[2,8,128], index: 1, kind: input, shape index: {}]   ;;  %s1293_s2 = inlined_call_operand.hbm [shape: f32[12,32], index: 2, kind: input, shape index: {}]   ;;  %s1294_s3 = inlined_call_operand.vmem [shape: f32[1,32], index: 3, kind: input, shape index: {}]   ;;  %s1295_s4 = inlined_call_operand.hbm [shape: f32[32,32], index: 4, kind: input, shape index: {}]   ;;  %s1296_s5 = inlined_call_operand.vmem [shape: f32[1,32], index: 5, kind: input, shape index: {}]   ;;  %s1297_s6 = inlined_call_operand.hbm [shape: f32[32,32], index: 6, kind: input, shape index: {}]   ;;  %s1298_s7 = inlined_call_operand.vmem [shape: f32[1,32], index: 7, kind: input, shape index: {}]   ;;  %s1299_s8 = inlined_call_operand.hbm [shape: f32[2,32], index: 8, kind: output, shape index: {}]  }
   0x1   :  { %1302 = sst [smem:[#allocation18_spill]] %s1292_s1 }
   0x2   :  { %1303 = sst [smem:[#allocation19_spill]] %s1293_s2 }
   0x3   :  { %1304 = sst [smem:[#allocation20_spill]] %s1295_s4 }
   0x4   :  { %13 = vsyncpa [#allocation5], 0 }
   0x5   :  { %15 = vsyncpa [#allocation5 + $0x1], 0 }
   0x6   :  { %16 = vsyncpa [#allocation8], 0 }
   0x7   :  { %17 = vsyncpa [#allocation11], 0 }
   0x8   :  { %18 = vsyncpa [#allocation6], 0  ;;  %s1136_s27 = smov 0   ;;  %s1138_s28 = smov 0  }
   0x9   :  { %s1140_s29 = smov 0   ;;  %s1142_s30 = smov 0  }
   0xa   :  { %s1144_s9 = smov 0   ;;  %s1146_s10 = smov 0  }
   0xb LB: > { %s1300_s11 = sadd.s32 4294967295, %s1077_s10   ;;  %p58_p0 = scmp.ne.s32.totalorder %s1061_s28, %s1057_s27  ;;  %s1077_s10 = sphi %s1146_s10, %s24_s10   ;;  %s1073_s9 = sphi %s1144_s9, %s1319_s9   ;;  %s1069_s30 = sphi %s1142_s30, %s1318_s30   ;;  %s1065_s29 = sphi %s1140_s29, %s1317_s29   ;;  %s1061_s28 = sphi %s1138_s28, %s1316_s28   ;;  %s1057_s27 = sphi %s1136_s27, %s1315_s27  }
   0xc   : > { %p1168_p1 = scmp.eq.s32.totalorder %s1300_s11, 0  ;;  %p695_p2 = scmp.ge.s32.totalorder %s1077_s10, 1 }
   0xd   : > { %p247_p3 = scmp.lt.s32.totalorder %s1077_s10, 3  ;;  %s1307_s1 = sld [smem:[#allocation18_spill]] }
   0xe   : > { %p1176_p4 = por %p1168_p1, %p58_p0  ;;  %s1079_s18 = smov [#allocation7]  }
   0xf   : > { %p1183_p5 = pnand %p695_p2, %p247_p3  ;;  %s263_s19 = sshll.u32 %s1079_s18, 4  ;;  %s264_s19 = int_to_ptr.vmem [resolvable:$true] %s263_s19 }
  0x10   : > { %s1310_s4 = sld [smem:[#allocation20_spill]]  ;;  %s1301_s24 = smov 64  }
  0x11   : > { %p746_p6 = pneg %p1183_p5  ;;  %s1081_s25 = smov 4  }
  0x12   : > { %s1082_s26 = smov [#allocation10]   ;;  %s1311_s2 = sld [smem:[#allocation19_spill]] }
  0x13   : > { %s261_s16 = sshll.u32 %s1307_s1, 4  ;;  %p1191_p7 = pnand %p746_p6, %p1168_p1  ;;  %s262_s16 = int_to_ptr.hbm [resolvable:$true] %s261_s16 }
  0x14   : > { %s294_s27 = sshll.u32 %s1082_s26, 4  ;;  %s1083_s21 = smov 128   ;;  %s295_s27 = int_to_ptr.vmem [resolvable:$true] %s294_s27 }
  0x15   : > { %749 = dma.hbm_to_vmem [thread:$0]  (!%p1191_p7), %s262_s16, 128, %s264_s19, [#allocation8], %s1301_s24, %s1301_s24, %s1081_s25  }
  0x16   : > { %s292_s23 = sshll.u32 %s1310_s4, 4  ;;  %s1084_s22 = smov 8   ;;  %s293_s23 = int_to_ptr.hbm [resolvable:$true] %s292_s23 }
  0x17   : > { %755 = dma.hbm_to_vmem [thread:$0]  (!%p1191_p7), %s293_s23, 512, %s295_s27, [#allocation11], %s1083_s21, %s1083_s21, %s1084_s22  }
  0x18   : > { %s275_s18 = sshll.u32 %s1311_s2, 4  ;;  %s309_s25 = sshll.u32 %s1297_s6, 4  ;;  %s276_s18 = int_to_ptr.hbm [resolvable:$true] %s275_s18  ;;  %s310_s25 = int_to_ptr.hbm [resolvable:$true] %s309_s25 }
  0x19   : > { %s1085_s26 = smov [#allocation9]   ;;  %s1086_s15 = smov [#allocation12]  }
  0x1a   : > { %s277_s14 = sshll.u32 %s1085_s26, 4  ;;  %s311_s11 = sshll.u32 %s1086_s15, 4  ;;  %s278_s14 = int_to_ptr.vmem [resolvable:$true] %s277_s14  ;;  %s312_s11 = int_to_ptr.vmem [resolvable:$true] %s311_s11 }
  0x1b   : > { %752 = dma.hbm_to_vmem [thread:$0]  (!%p1191_p7), %s276_s18, 256, %s278_s14, [#allocation8], %s1083_s21, %s1083_s21, %s1084_s22  }
  0x1c   : > { %758 = dma.hbm_to_vmem [thread:$0]  (!%p1191_p7), %s310_s25, 512, %s312_s11, [#allocation11], %s1083_s21, %s1083_s21, %s1084_s22  }
  0x1d   : > { %s33_s23 = sadd.s32 1, %s1073_s9  ;;  %s45_s27 = sadd.s32 1, %s1065_s29 }
  0x1e   : > { %p34_p8 = scmp.ge.s32.totalorder %s33_s23, 2  ;;  %p52_p9 = scmp.ne.s32.totalorder %s1065_s29, %s1061_s28 }
  0x1f   : > { %p53_p10 = scmp.eq.s32.totalorder %s1077_s10, 0  ;;  %p767_p11 = scmp.lt.s32.totalorder %s1077_s10, 2 }
  0x20   : > { %s1321_s23 = smov (%p34_p8, %s33_s23), 0  ;;  %s328_s18 = sand.u32 1, %s1065_s29  }
  0x21   : > { %p1222_p12 = por %p53_p10, %p52_p9  ;;  %s41_s19 = ssub.s32 %s1073_s9, %s1321_s23 }
  0x22   : > { %p43_p13 = scmp.eq.s32.totalorder %s41_s19, 0  ;;  %s701_s20 = sshll.u32 %s328_s18, 2 }
  0x23   : > { %s702_s11 = sshll.u32 %s1073_s9, 1  ;;  %s332_s14 = scalar_lea.vmem [#allocation4], %s701_s20 }
  0x24   : > { %s1231_s21 = scalar_select %p43_p13, %s1065_s29, %s45_s27  }
  0x25   : > { %s339_s26 = scalar_lea.hbm %s1291_s0, %s702_s11  ;;  %s342_s15 = sshll.u32 %s332_s14, 4  ;;  %s343_s15 = int_to_ptr.vmem [resolvable:$true] %s342_s15 }
  0x26   : > { %s340_s24 = sshll.u32 %s339_s26, 4  ;;  %p760_p0 = pnand %p767_p11, %p1222_p12  ;;  %s341_s24 = int_to_ptr.hbm [resolvable:$true] %s340_s24 }
  0x27   : > { %s329_s1 = scalar_lea.sflag [#allocation5], %s328_s18  ;;  %s1087_s2 = smov 32  }
  0x28   : > { %s1088_s4 = smov 2   ;;  %s1313_s19 = smov 64  }
  0x29   : > { %762 = dma.hbm_to_vmem [thread:$0]  (!%p760_p0), %s341_s24, 64, %s343_s15, %s329_s1, %s1313_s19, %s1087_s2, %s1088_s4  }
  0x2a   : > { %354 = sbr.rel (%p1183_p5) target bundleno = 617 (0x269), region = 52  ;;  %s356_s27 = sand.u32 (!%p1183_p5), 1, %s1061_s28  }
  0x2b   : > { %s704_s11 = sshll.u32 (!%p1183_p5), %s356_s27, 2  ;;  %s357_s20 = scalar_lea.sflag (!%p1183_p5), [#allocation5], %s356_s27 }
  0x2c   : > { %s360_s22 = scalar_lea.vmem (!%p1183_p5), [#allocation4], %s704_s11 }
  0x2f   : > { %1040 = dma.done.wait (%p1176_p4), %s357_s20, 64  }
  0x30   : > { %1042 = vsyncadd (%p1176_p4), %s357_s20, 4294967232 }
  0x31   : > { %1044 = dma.done.wait (%p1168_p1), [#allocation8], 384  }
  0x32   : > { %1046 = vsyncadd (%p1168_p1), [#allocation8], 4294966912 }
  0x33   : > { %1048 = dma.done.wait (%p1168_p1), [#allocation11], 1024  }
  0x34   : > { %1050 = vsyncadd (%p1168_p1), [#allocation11], 4294966272  ;;  %p709_p2 = scmp.ne.s32.totalorder %s1069_s30, 0 }
  0x36   : > { %414 = sbr.rel (%p709_p2) target bundleno = 64 (0x40), region = 76 }
  0x3b   : > { %v1089_v0 = vmov 0.0  }
  0x3c   : > { %415 = vst [vmem:[#allocation2] sm:$0xf] %v1089_v0 }
  0x3d   : > { %416 = vst [vmem:[#allocation2 + $0x4] sm:$0xf] %v1089_v0 }
  0x3e   : > { %417 = vst [vmem:[#allocation3] sm:$0xff] %v1089_v0 }
  0x3f   : > { %418 = vst [vmem:[#allocation3 + $0x8] sm:$0xff] %v1089_v0 }
  0x40 PF: > { %v419_v1 = vld [vmem:[%s360_s22] sm:$0x3]  ;;  %v420_v3 = vld [vmem:[%s360_s22 + $0x2] sm:$0x3]  ;;  %p710_p1 = scmp.ge.s32.totalorder %s1069_s30, 1 }
  0x41   : > { %v421_v4 = vunpack.c.l.bf16 %v419_v1  ;;  %v422_v5 = vunpack.c.l.bf16 %v420_v3 }
  0x43   : > { %v423_v2 = vld [vmem:[#allocation2] sm:$0xf]  ;;  %432 = sbr.rel (%p710_p1) target bundleno = 79 (0x4f), region = 80 }
  0x44   : > { %v424_v6 = vld [vmem:[#allocation2 + $0x4] sm:$0xf]  ;;  %v425_v7 = vadd.f32 %v423_v2, %v421_v4 }
  0x45   : > { %v426_v8 = vadd.f32 %v424_v6, %v422_v5 }
  0x46   : > { %427 = vst [vmem:[#allocation2] sm:$0xf] %v425_v7 }
  0x47   : > { %428 = vst [vmem:[#allocation2 + $0x4] sm:$0xf] %v426_v8 }
  0x48   : > { %v721_v9 = vld [vmem:[#allocation7] sm:$0xff]   ;;  %v437_v10 = vld [vmem:[#allocation3] sm:$0xff]  ;;  %v438_v11 = vld [vmem:[#allocation3 + $0x8] sm:$0xff] }
  0x49   : > { %v722_v12 = vunpack.c.l.bf16 %v721_v9  ;;  %v723_v13 = vunpack.c.h.bf16 %v721_v9 }
  0x4b   : > { %v439_v14 = vadd.f32 %v722_v12, %v437_v10  ;;  %v440_v15 = vadd.f32 %v723_v13, %v438_v11 }
  0x4d   : > { %441 = vst [vmem:[#allocation3] sm:$0xff] %v439_v14 }
  0x4e   : > { %442 = vst [vmem:[#allocation3 + $0x8] sm:$0xff] %v440_v15 }
  0x4f PF: > { %p711_p3 = scmp.ne.s32.totalorder %s1069_s30, 1 }
  0x51   : > { %446 = sbr.rel (%p711_p3) target bundleno = 611 (0x263), region = 84 }
  0x56   : > { %v456_v16 = vld [vmem:[#allocation3] sm:$0xff]  ;;  %v447_v17 = vld [vmem:[#allocation2] sm:$0xf]  ;;  %vm449_vm0 = vcmask 1043456   ;;  %v448_v19 = vld [vmem:[#allocation2 + $0x4] sm:$0xf]  ;;  %v464_v25 = vlaneseq }
  0x57   : > { %458 = vadd.xlane.f32.xlu1 %v456_v16  ;;  %v450_v18 = vsel %vm449_vm0, %v447_v17, 0.0  ;;  %v457_v20 = vld [vmem:[#allocation3 + $0x8] sm:$0xff]  ;;  %v453_v21 = vsel %vm449_vm0, %v448_v19, 0.0  ;;  %v480_v23 = vld [vmem:[#allocation9] sm:$0xff]  ;;  %vm468_vm1 = vcmask 1041409   ;;  %vm478_vm2 = vcmask 31744  }
  0x58   : > { %451 = vadd.xlane.f32.xlu0 %v450_v18  ;;  %v481_v22 = vld [vmem:[#allocation9 + $0x8] sm:$0xf]  ;;  %v465_v27 = vand.u32 127, %v464_v25  ;;  %vm486_vm3 = vcmask 97280   ;;  %v516_v39 = vld [vmem:[#allocation10 + $0x10] sm:$0xff]  ;;  %v515_v40 = vld [vmem:[#allocation10 + $0x8] sm:$0xff] }
  0x59   : > { %712 = vmatpush.msk.msra.mxu0 %vm449_vm0, %v481_v22  ;;  %v517_v24 = vld [vmem:[#allocation10 + $0x18] sm:$0xff]  ;;  %v514_v41 = vld [vmem:[#allocation10] sm:$0xff]  ;;  %v834_v43 = vld [vmem:[%s1294_s3] ss:$0 sm:$0xff]  ;;  %vm522_vm4 = vcmask 261120   ;;  %vm578_vm5 = vcmask 254976  }
  0x5a   : > { %538 = vmatpush.msra.mxu1 %v517_v24  ;;  %v473_v29 = vadd.s32 4294967292, %v465_v27  ;;  %v550_v42 = vld [vmem:[#allocation12 + $0x18] sm:$0xff]  ;;  %v549_v47 = vld [vmem:[#allocation12 + $0x10] sm:$0xff]  ;;  %v548_v48 = vld [vmem:[#allocation12 + $0x8] sm:$0xff] }
  0x5b   : > { %508 = vmatpush.msra.mxu0 %v480_v23  ;;  %570 = vmatpush.msra.mxu2 %v550_v42  ;;  %v547_v49 = vld [vmem:[#allocation12] sm:$0xff]  ;;  %v835_v50 = vld [vmem:[%s1296_s5] ss:$0 sm:$0xff] }
  0x5c   : > { %539 = vmatpush.msra.mxu1 %v516_v39  ;;  %v836_v54 = vld [vmem:[%s1298_s7] ss:$0 sm:$0xff] }
  0x5d   : > { %571 = vmatpush.msra.mxu2 %v549_v47 }
  0x5e   : > { %540 = vmatpush.msra.mxu1 %v515_v40 }
  0x5f   : > { %460 = vadd.xlane.f32.xlu1 %v457_v20  ;;  %572 = vmatpush.msra.mxu2 %v548_v48 }
  0x60   : > { %454 = vadd.xlane.f32.xlu0 %v453_v21  ;;  %541 = vmatpush.msra.mxu1 %v514_v41 }
  0x61   : > { %573 = vmatpush.msra.mxu2 %v547_v49 }
  0xca   : > { %v459_v26 = vpop.xlane.xlu1 %458 }
  0xcb   : > { %v452_v28 = vpop.xlane.xlu0 %451  ;;  %v474_v31 = vperm.slane %v459_v26, %v473_v29 }
  0xcc   : > { %v466_v34 = vperm.slane %v452_v28, %v465_v27 }
  0xd2   : > { %v461_v30 = vpop.xlane.xlu1 %460 }
  0xd3   : > { %v475_v32 = vperm.slane %v461_v30, %v473_v29  ;;  %v455_v33 = vpop.xlane.xlu0 %454 }
  0xd4   : > { %v467_v35 = vperm.slane %v455_v33, %v465_v27 }
  0xd5   : > { %v476_v36 = vsel %vm468_vm1, %v475_v32, %v474_v31 }
  0xd6   : > { %v469_v37 = vsel %vm468_vm1, %v467_v35, %v466_v34 }
  0xd7   : > { %v479_v38 = vsel %vm478_vm2, %v469_v37, %v476_v36 }
  0xd8   : > { %713 = vmatmul.msk.f32.vlgmr.msra.gmra.mxu0 %vm486_vm3, %v479_v38 }
 0x155   : > { %v510_v44 = vpop.f32.mrf.mxu0 }
 0x156   : > { %v511_v45 = vadd.f32 %v834_v43, %v510_v44 }
 0x158   : > { %v513_v46 = vmax.f32 %v511_v45, 0.0 }
 0x15a   : > { %714 = vmatmul.msk.f32.vlgmr.msra.gmra.mxu1 %vm522_vm4, %v513_v46 }
 0x1d7   : > { %v543_v51 = vpop.f32.mrf.mxu1 }
 0x1d8   : > { %v544_v52 = vadd.f32 %v835_v50, %v543_v51 }
 0x1da   : > { %v546_v53 = vmax.f32 %v544_v52, 0.0 }
 0x1dc   : > { %715 = vmatmul.msk.f32.vlgmr.msra.gmra.mxu2 %vm522_vm4, %v546_v53 }
 0x25f   : > { %v575_v55 = vpop.f32.mrf.mxu2 }
 0x260   : > { %v576_v56 = vadd.f32 %v836_v54, %v575_v55 }
 0x262   : > { %579 = vst.msk [vmem:[#allocation13] sm:$0x3] %vm578_vm5, %v576_v56 }
 0x263 PF: > { %s1314_s17 = sadd.s32 4294967295, %s1077_s10   ;;  %s590_s18 = sshll.u32 %s1299_s8, 4  ;;  %s591_s18 = int_to_ptr.hbm [resolvable:$true] %s590_s18 }
 0x264   : > { %p772_p4 = scmp.eq.s32.totalorder %s1314_s17, 1  ;;  %s1090_s25 = smov [#allocation13]  }
 0x265   : > { %s588_s26 = sshll.u32 %s1090_s25, 4  ;;  %s589_s26 = int_to_ptr.vmem [resolvable:$true] %s588_s26 }
 0x266   : > { %743 = dma.vmem_to_hbm [thread:$0]  (%p772_p4), %s589_s26, 32, %s591_s18, [#allocation6]  }
 0x267   : > { %1052 = dma.done.wait (%p772_p4), [#allocation6], 32  }
 0x268   : > { %1054 = vsyncadd (%p772_p4), [#allocation6], 4294967264 }
 0x269 PF: > { %s24_s10 = sadd.s32 1, %s1077_s10   ;;  %s1315_s27 = smov %s1061_s28 }
 0x26a   : > { %p21_p5 = scmp.ge.s32.totalorder %s24_s10, 4   ;;  %s1316_s28 = smov %s1065_s29 }
 0x26b   : > { %s1317_s29 = smov %s1231_s21  ;;  %s1318_s30 = smov %s1073_s9 }
 0x26c   : > { %s1319_s9 = smov %s1321_s23  ;;  %23 = sbr.rel (!%p21_p5) target bundleno = 11 (0xb), region = 119 }
 0x271   :  { %604 = vsyncpa [#allocation5], 1 }
 0x272   :  { %606 = vsyncpa [#allocation5 + $0x1], 1 }
 0x273   :  { %607 = vsyncpa [#allocation8], 1 }
 0x274   :  { %608 = vsyncpa [#allocation11], 1 }
 0x275   :  { %609 = vsyncpa [#allocation6], 1 }
 0x276   :  { %611 = vsyncpa [#allocation6 + $0x1], 1 }

</bundles_post_ra>
